<compile_context>
chip_gen: v7x
topology: tpu7x:2x2x1
jax: 0.10.0
libtpu: 0.0.40
codegen_flags: <defaults>
</compile_context>

<pallas_src>
import functools
import math
import random as pyrandom

import jax
import jax.numpy as jnp
from jax.experimental import pallas as pl
from jax.experimental.pallas import tpu as pltpu


_LANE = 128


def _sublane_multiple(dtype):
    """Sublane packing multiple: 8 for 4-byte, 16 for 2-byte, 32 for 1-byte."""
    itemsize = jnp.dtype(dtype).itemsize
    return max(8, 32 // max(1, itemsize))


def _tpu_vmem_bytes():
    try:
        return int(pltpu.get_tpu_info().vmem_capacity_bytes)
    except Exception:
        return 64 * 1024 * 1024  # conservative (v7x per-TC VMEM)


def _num_tensorcores():
    try:
        kind = jax.devices()[0].device_kind.lower()
        if "v7" in kind or "tpu7" in kind:
            return 2
    except Exception:
        pass
    return 1


def _vmem_limit_bytes(block_bytes, vmem_cap):
    # in + out double buffers plus f32 temps ~ 8x the input block, capped well
    # below physical VMEM.
    cap = int(0.75 * vmem_cap)
    want = max(32 * 1024 * 1024, 8 * int(block_bytes))
    return max(16 * 1024 * 1024, min(cap, want))


def _cast_out(y, dtype):
    if jnp.issubdtype(dtype, jnp.integer):
        info = jnp.iinfo(dtype)
        y = jnp.clip(jnp.round(y), info.min, info.max)
    return y.astype(dtype)


# --------------------------------------------------------------------------
# Kernels
# --------------------------------------------------------------------------
def _contrast_rows_kernel(x_ref, o_ref, *, inv_n, strength):
    """Single-pass: each block holds whole flattened rows (samples)."""
    x = x_ref[...]
    # f32 accumulation without materializing an f32 copy of the block.
    m = jnp.sum(x, axis=-1, keepdims=True, dtype=jnp.float32) * inv_n
    y = (x - m) * strength + m            # affine in f32 (promotion), cast once
    o_ref[...] = _cast_out(y, o_ref.dtype)


def _contrast_cols_kernel(x_ref, o_ref, sum_ref, *, inv_n, strength,
                          n_valid, col_tile):
    """Two-pass column-tiled path for rows too large for one block.

    grid = (row_blocks, 2, col_blocks); pass 0 accumulates partial row sums in
    VMEM scratch, pass 1 applies the per-sample affine and writes the output.
    """
    p = pl.program_id(1)
    j = pl.program_id(2)

    @pl.when(jnp.logical_and(p == 0, j == 0))
    def _():
        sum_ref[...] = jnp.zeros_like(sum_ref)

    @pl.when(p == 0)
    def _():
        x = x_ref[...]
        # Mask out-of-range columns of the (possibly ragged) last column block.
        col = jax.lax.broadcasted_iota(jnp.int32, x.shape, 1) + j * col_tile
        xm = jnp.where(col < n_valid, x, jnp.zeros_like(x))
        sum_ref[...] += jnp.sum(xm, axis=-1, keepdims=True, dtype=jnp.float32)

    @pl.when(p == 1)
    def _():
        m = sum_ref[...] * inv_n
        y = (x_ref[...] - m) * strength + m
        o_ref[...] = _cast_out(y, o_ref.dtype)


# --------------------------------------------------------------------------
# Wrappers
# --------------------------------------------------------------------------
def _contrast_pallas(x, *, strength=1.5, block_budget_bytes=None):
    """Per-sample contrast (DiffAugment-style) on an NCHW tensor via Pallas."""
    orig_shape = x.shape
    B = orig_shape[0]
    n = int(math.prod(orig_shape[1:]))
    x2d = x.reshape(B, n)

    dtype = x2d.dtype
    itemsize = jnp.dtype(dtype).itemsize
    sub = _sublane_multiple(dtype)
    min_rows = min(B, sub)

    vmem_cap = _tpu_vmem_bytes()
    num_tc = _num_tensorcores()
    if block_budget_bytes is None:
        budget = int(min(16 * 1024 * 1024, max(2 * 1024 * 1024, vmem_cap // 16)))
    else:
        budget = max(1024, int(block_budget_bytes))

    row_bytes = n * itemsize
    inv_n = 1.0 / float(n)

    # Decide between single-pass (whole rows per block) and column-tiled path.
    use_col = min_rows * row_bytes > budget
    if use_col:
        bt = min_rows
        tc = max(_LANE, (budget // max(1, bt * itemsize)) // _LANE * _LANE)
        use_col = tc < n

    if not use_col:
        # -------- single-pass: full row extent in the lane dim --------
        rows_fit = max(1, budget // max(1, row_bytes))
        bt = min(B, max(min_rows, (rows_fit // sub) * sub))
        if num_tc > 1:
            # Keep several grid steps so the "parallel" axis shards across TCs.
            cap = ((B // (2 * num_tc)) // sub) * sub
            if cap >= sub:
                bt = min(bt, cap)
            else:
                cap2 = ((B // 2) // sub) * sub
                if cap2 >= sub:
                    bt = min(bt, cap2)
        bt = max(1, min(B, bt))

        block_bytes = bt * n * itemsize
        kernel = functools.partial(_contrast_rows_kernel,
                                   inv_n=inv_n, strength=strength)
        out2d = pl.pallas_call(
            kernel,
            out_shape=jax.ShapeDtypeStruct((B, n), dtype),
            grid=(pl.cdiv(B, bt),),
            in_specs=[pl.BlockSpec((bt, n), lambda i: (i, 0))],
            out_specs=pl.BlockSpec((bt, n), lambda i: (i, 0)),
            compiler_params=pltpu.CompilerParams(
                dimension_semantics=("parallel",),
                vmem_limit_bytes=_vmem_limit_bytes(block_bytes, vmem_cap),
            ),
        )(x2d)
    else:
        # -------- two-pass column-tiled mean for huge rows --------
        block_bytes = bt * tc * itemsize
        kernel = functools.partial(_contrast_cols_kernel,
                                   inv_n=inv_n, strength=strength,
                                   n_valid=n, col_tile=tc)
        grid = (pl.cdiv(B, bt), 2, pl.cdiv(n, tc))
        out2d = pl.pallas_call(
            kernel,
            out_shape=jax.ShapeDtypeStruct((B, n), dtype),
            grid=grid,
            in_specs=[pl.BlockSpec((bt, tc), lambda i, p, j: (i, j))],
            # Pass 0 keeps the output block index pinned at (i, 0) so nothing is
            # flushed until pass 1 overwrites it with real data (1x write total).
            out_specs=pl.BlockSpec((bt, tc), lambda i, p, j: (i, j * p)),
            scratch_shapes=[pltpu.VMEM((bt, 1), jnp.float32)],
            compiler_params=pltpu.CompilerParams(
                dimension_semantics=("parallel", "arbitrary", "arbitrary"),
                vmem_limit_bytes=_vmem_limit_bytes(block_bytes, vmem_cap),
            ),
        )(x2d)

    return out2d.reshape(orig_shape)


def random_apply(x, seed, prob, strength=1.5, block_budget_bytes=None):
    """AugWrapper-style gate: augment(x) if random() < prob else x.

    The Bernoulli(prob) draw is a host-side Python RNG (deterministic per
    `seed`), so there is no device->host sync; the identity branch — which is
    exactly AGGAN.forward's semantics — launches no kernel at all.
    """
    u = pyrandom.Random(int(seed)).random()
    if not (u < prob):
        return x
    return _contrast_pallas(x, strength=strength,
                            block_budget_bytes=block_budget_bytes)


def aggan_forward(x):
    """AGGAN.forward is the identity."""
    return x


# --------------------------------------------------------------------------
# Self-test
# --------------------------------------------------------------------------
if __name__ == "__main__":
    def ref_contrast(t, strength=1.5):
        tf = t.astype(jnp.float32)
        m = jnp.mean(tf, axis=tuple(range(1, t.ndim)), keepdims=True)
        return ((tf - m) * strength + m).astype(t.dtype)

    key = jax.random.PRNGKey(0)
    B, C, H, W = 2, 4, 16, 16
    x = jax.random.normal(key, (B, C, H, W), dtype=jnp.float32)

    # AGGAN.forward itself: identity.
    assert jnp.array_equal(aggan_forward(x), x)

    # prob = 1.0 -> augmentation branch always taken (kernel runs).
    out_fn = jax.block_until_ready(random_apply(x, seed=1234, prob=1.0))
    assert out_fn.shape == x.shape and out_fn.dtype == x.dtype
    assert jnp.allclose(out_fn, ref_contrast(x), atol=1e-4, rtol=1e-4)

    # prob = 0.0 -> identity branch (no kernel launch, zero data movement).
    out_id = jax.block_until_ready(random_apply(x, seed=1234, prob=0.0))
    assert jnp.array_equal(out_id, x)

    # prob = 0.5 -> branch decided by the hoisted host-side draw; the output
    # must match exactly the branch implied by the same seed.
    seed, prob = 7, 0.5
    out = jax.block_until_ready(random_apply(x, seed=seed, prob=prob))
    took_fn = pyrandom.Random(seed).random() < prob
    expected = ref_contrast(x) if took_fn else x
    assert jnp.allclose(out, expected, atol=1e-4, rtol=1e-4)

    # bf16 input: 16-row sublane packing, affine done in f32, single cast.
    xb = jax.random.normal(jax.random.PRNGKey(1), (B, C, H, W),
                           dtype=jnp.bfloat16)
    outb = jax.block_until_ready(random_apply(xb, seed=3, prob=1.0))
    assert outb.dtype == jnp.bfloat16
    assert jnp.allclose(outb.astype(jnp.float32),
                        ref_contrast(xb).astype(jnp.float32),
                        atol=5e-2, rtol=5e-2)

    # Ragged last row-block (B=10 with an 8-row tile), forced by a small budget.
    xr = jax.random.normal(jax.random.PRNGKey(2), (10, C, H, W),
                           dtype=jnp.float32)
    outr = jax.block_until_ready(
        random_apply(xr, seed=3, prob=1.0, block_budget_bytes=8 * 4 * C * H * W))
    assert jnp.allclose(outr, ref_contrast(xr), atol=1e-4, rtol=1e-4)

    # Column-tiled two-pass mean path (forced with a tiny budget); the ragged
    # last column block exercises the in-kernel column mask.
    xc = jax.random.normal(jax.random.PRNGKey(3), (2, 3, 16, 16),
                           dtype=jnp.float32)
    outc = jax.block_until_ready(
        random_apply(xc, seed=3, prob=1.0, block_budget_bytes=4096))
    assert jnp.allclose(outc, ref_contrast(xc), atol=1e-4, rtol=1e-4)

    print("KERNEL_OK")
</pallas_src>

<mosaic_0001>
module attributes {stable_mosaic.version = 11 : i64} {
  func.func @_contrast_rows_kernel(%arg0: i32, %arg1: memref<2x1024xf32, #tpu.memory_space<vmem>>, %arg2: memref<2x1024xf32, #tpu.memory_space<vmem>>) attributes {dimension_semantics = [#tpu.dimension_semantics<parallel>], iteration_bounds = array<i64: 1>, scalar_prefetch = 0 : i64, scratch_operands = 0 : i64, tpu.core_type = #tpu.core_type<tc>, window_params = [{transform_indices = @transform_0, window_bounds = array<i64: 2, 1024>}, {transform_indices = @transform_1, window_bounds = array<i64: 2, 1024>}]} {
    %c0 = arith.constant 0 : index
    %c0_0 = arith.constant 0 : index
    %0 = vector.load %arg1[%c0, %c0_0] : memref<2x1024xf32, #tpu.memory_space<vmem>>, vector<2x1024xf32>
    %cst = arith.constant dense<0.000000e+00> : vector<2xf32>
    %1 = vector.multi_reduction <add>, %0, %cst [1] : vector<2x1024xf32> to vector<2xf32>
    %2 = vector.shape_cast %1 : vector<2xf32> to vector<2x1xf32>
    %cst_1 = arith.constant 9.765625E-4 : f32
    %3 = vector.broadcast %cst_1 : f32 to vector<2x1xf32>
    %4 = arith.mulf %2, %3 : vector<2x1xf32>
    %5 = vector.broadcast %4 : vector<2x1xf32> to vector<2x1024xf32>
    %6 = arith.subf %0, %5 : vector<2x1024xf32>
    %cst_2 = arith.constant 1.500000e+00 : f32
    %7 = vector.broadcast %cst_2 : f32 to vector<2x1024xf32>
    %8 = arith.mulf %6, %7 : vector<2x1024xf32>
    %9 = vector.broadcast %4 : vector<2x1xf32> to vector<2x1024xf32>
    %10 = arith.addf %8, %9 : vector<2x1024xf32>
    %c0_3 = arith.constant 0 : index
    %c0_4 = arith.constant 0 : index
    %11 = vector.load %arg2[%c0_3, %c0_4] : memref<2x1024xf32, #tpu.memory_space<vmem>>, vector<2x1024xf32>
    tpu.vector_store %arg2[%c0_3, %c0_4], %10 {strides = array<i32>} : memref<2x1024xf32, #tpu.memory_space<vmem>>, vector<2x1024xf32>,
    return
  }
  func.func @transform_0(%arg0: i32) -> (i32, i32) {
    %c0_i32 = arith.constant 0 : i32
    %c0_i32_0 = arith.constant 0 : i32
    return %arg0, %c0_i32 : i32, i32
  }
  func.func @transform_1(%arg0: i32) -> (i32, i32) {
    %c0_i32 = arith.constant 0 : i32
    %c0_i32_0 = arith.constant 0 : i32
    return %arg0, %c0_i32 : i32, i32
  }
}

</mosaic_0001>

<bundles_post_ra>
// kernel: tpu_custom_call.1
= control target key start
LH: loop header
LB: loop body
LE: loop exit
PB: predicated region body
PF: predicated region fallthrough
CT: control target
= control target key end

     0   :  { %6 = vsyncpa [#allocation3], 0  ;;  %s218_s0 = inlined_call_operand.hbm [shape: f32[2,1024], index: 0, kind: input, shape index: {}]   ;;  %s219_s1 = inlined_call_operand.hbm [shape: f32[2,1024], index: 1, kind: output, shape index: {}]  }
   0x1   :  { %7 = vsyncpa [#allocation4], 0  ;;  %s172_s6 = smov [#allocation2]   ;;  %s124_s10 = scalar_lea.hbm %s218_s0, 256 }
   0x2   :  { %s14_s7 = sshll.u32 %s172_s6, 4  ;;  %p125_p0 = scmp.ne.s32.totalorder %s218_s0, %s124_s10  ;;  %s15_s7 = int_to_ptr.vmem [resolvable:$true] %s14_s7 }
   0x3   :  { %p128_p1 = scmp.lt.u32.totalorder %s124_s10, %s218_s0 }
   0x5   :  { %p130_p2 = pnand %p128_p1, %p125_p0 }
   0x7   :  { %133 = shalt.err (!%p130_p2)
}
   0x8   :  { %s134_s15 = scalar_lea.vmem %s15_s7, 256  ;;  %p139_p4 = scmp.lt.s32.totalorder %s15_s7, %s15_s7 }
   0x9   :  { %p135_p3 = scmp.ne.s32.totalorder %s15_s7, %s134_s15  ;;  %p140_p5 = scmp.lt.s32.totalorder %s134_s15, %s134_s15 }
   0xb   :  { %p141_p6 = por %p140_p5, %p139_p4 }
   0xd   :  { %p142_p7 = pnand %p141_p6, %p135_p3 }
   0xf   :  { %145 = shalt.err (!%p142_p7)
}
  0x10   :  { %17 = dma.hbm_to_vmem [thread:$0]  %s218_s0, 256, %s15_s7, [#allocation3]  }
  0x11   :  { %168 = dma.done.wait [#allocation3], 256  }
  0x12   :  { %169 = vsyncadd [#allocation3], 4294967040  ;;  %v29_v0 = vlaneseq  ;;  %v173_v1 = vmov 1983009808   ;;  %v21_v6 = vld [vmem:[#allocation2] sm:$0xff]  ;;  %v22_v7 = vld [vmem:[#allocation2 + $0x8] sm:$0xff] }
  0x13   :  { %v27_v2 = vunpack.c.l.s4 %v173_v1  ;;  %v25_v8 = vcombine.high %v21_v6, %v21_v6  ;;  %vm67_vm0 = vcmask 1041408   ;;  %v42_v12 = vcombine.high %v22_v7, %v22_v7  ;;  %s175_s0 = smov [#allocation5]  }
  0x14   :  { %v30_v3 = vshrl.u32 %v29_v0, 7  ;;  %v174_v33 = vmov 269488144   ;;  %s109_s18 = sshll.u32 %s175_s0, 4  ;;  %s110_s18 = int_to_ptr.vmem [resolvable:$true] %s109_s18 }
  0x15   :  { %v28_v4 = vunpack.c.0.s8 %v27_v2  ;;  %v88_v34 = vunpack.c.l.s4 %v174_v33  ;;  %s146_s19 = scalar_lea.vmem %s110_s18, 256  ;;  %p151_p9 = scmp.lt.s32.totalorder %s110_s18, %s110_s18 }
  0x16   :  { %p147_p8 = scmp.ne.s32.totalorder %s110_s18, %s146_s19  ;;  %p152_p10 = scmp.lt.s32.totalorder %s146_s19, %s146_s19 }
  0x17   :  { %v31_v5 = vsub.s32 %v28_v4, %v30_v3  ;;  %v89_v35 = vunpack.c.0.s8 %v88_v34 }
  0x18   :  { %p153_p11 = por %p152_p10, %p151_p9 }
  0x19   :  { %v32_v9 = vrot.slane %v21_v6, %v31_v5  ;;  %v39_v10 = vrot.slane %v25_v8, %v31_v5  ;;  %v49_v13 = vrot.slane %v22_v7, %v31_v5  ;;  %v56_v19 = vrot.slane %v42_v12, %v31_v5 }
  0x1a   :  { %v92_v36 = vsub.s32 %v89_v35, %v30_v3  ;;  %p154_p12 = pnand %p153_p11, %p147_p8 }
  0x1b   :  { %v40_v11 = vcombine.high %v32_v9, %v32_v9  ;;  %v68_v14 = vsel %vm67_vm0, %v32_v9, 0.0  ;;  %v41_v15 = vcombine.high %v39_v10, %v39_v10  ;;  %v71_v17 = vsel %vm67_vm0, %v39_v10, 0.0 }
  0x1c   :  { %v57_v20 = vcombine.high %v49_v13, %v49_v13  ;;  %v75_v23 = vsel %vm67_vm0, %v49_v13, 0.0  ;;  %v58_v25 = vcombine.high %v56_v19, %v56_v19  ;;  %v79_v28 = vsel %vm67_vm0, %v56_v19, 0.0 }
  0x1d   :  { %v69_v16 = vsel %vm67_vm0, %v40_v11, 0.0  ;;  %v73_v21 = vsel %vm67_vm0, %v41_v15, 0.0 }
  0x1e   :  { %v70_v18 = vadd.f32 %v69_v16, %v68_v14  ;;  %v77_v26 = vsel %vm67_vm0, %v57_v20, 0.0  ;;  %v81_v30 = vsel %vm67_vm0, %v58_v25, 0.0 }
  0x20   :  { %v72_v22 = vadd.f32 %v71_v17, %v70_v18 }
  0x22   :  { %v74_v24 = vadd.f32 %v73_v21, %v72_v22 }
  0x24   :  { %v76_v27 = vadd.f32 %v75_v23, %v74_v24 }
  0x26   :  { %v78_v29 = vadd.f32 %v77_v26, %v76_v27 }
  0x28   :  { %v80_v31 = vadd.f32 %v79_v28, %v78_v29 }
  0x2a   :  { %v82_v32 = vadd.f32 %v81_v30, %v80_v31 }
  0x2c   :  { %83 = vadd.xlane.f32.xlu0 %v82_v32 }
  0xb9   :  { %v84_v37 = vpop.xlane.xlu0 %83 }
  0xba   :  { %v85_v38 = vmul.f32 0.0009765625, %v84_v37 }
  0xbc   :  { %v93_v39 = vrot.slane %v85_v38, %v92_v36 }
  0xbe   :  { %v95_v40 = vsub.f32 %v21_v6, %v93_v39  ;;  %v96_v41 = vsub.f32 %v22_v7, %v93_v39 }
  0xc0   :  { %v97_v42 = vmul.f32 1.5, %v95_v40  ;;  %v98_v43 = vmul.f32 1.5, %v96_v41 }
  0xc2   :  { %v99_v44 = vadd.f32 %v97_v42, %v93_v39  ;;  %v100_v45 = vadd.f32 %v98_v43, %v93_v39 }
  0xc4   :  { %101 = vst [vmem:[#allocation5] sm:$0xff] %v99_v44  ;;  %102 = vst [vmem:[#allocation5 + $0x8] sm:$0xff] %v100_v45 }
  0xc5   :  { %157 = shalt.err (!%p154_p12)
}
  0xc6   :  { %s158_s22 = scalar_lea.hbm %s219_s1, 256 }
  0xc7   :  { %p159_p13 = scmp.ne.s32.totalorder %s219_s1, %s158_s22  ;;  %p162_p0 = scmp.lt.u32.totalorder %s158_s22, %s219_s1 }
  0xc9   :  { %p164_p1 = pnand %p162_p0, %p159_p13 }
  0xcb   :  { %167 = shalt.err (!%p164_p1)
}
  0xcc   :  { %112 = dma.vmem_to_hbm [thread:$0]  %s110_s18, 256, %s219_s1, [#allocation4]  }
  0xcd   :  { %170 = dma.done.wait [#allocation4], 256  }
  0xce   :  { %171 = vsyncadd [#allocation4], 4294967040 }
  0xcf   :  { %116 = vsyncpa [#allocation3], 1 }
  0xd0   :  { %117 = vsyncpa [#allocation4], 1 }

</bundles_post_ra>
